<compile_context>
chip_gen: v7x
topology: tpu7x:2x2x1
jax: 0.10.0
libtpu: 0.0.40
codegen_flags: <defaults>
</compile_context>

<pallas_src>
import functools

import jax
import jax.numpy as jnp
from jax import lax
from jax.experimental import pallas as pl
from jax.experimental.pallas import tpu as pltpu


LANE = 128  # lane-dense width for trunk activations and the head-output slab


def _round_up(n, m):
    return ((n + m - 1) // m) * m


def _pick_block_rows(batch, max_rows=1024):
    """Choose a lane/sublane-friendly row block (multiple of 16 for bf16 input)."""
    padded = _round_up(batch, 16)
    if padded <= 256:
        # Tiny batch: per-step overhead dominates, keep it a single grid step.
        return padded
    if padded >= 2 * max_rows:
        # Big batch: cap the block; grid has >= 2 steps automatically.
        return max_rows
    # Medium batch: split into 2 balanced "parallel" steps (v7x megacore).
    return _round_up((padded + 1) // 2, 16)


# ----------------------------------------------------------------------------
# Fused Pallas kernel: shared MLP + all heads, one lane-dense store
# ----------------------------------------------------------------------------
def decoder_fused_kernel(x_ref, w1_ref, b1_ref, w2_ref, b2_ref, w3_ref, b3_ref,
                         wh_ref, bh_ref, out_ref, *, segments):
    # Shared trunk: Linear->ReLU x3. bf16 operands, f32 accumulation, f32 bias.
    # All intermediate widths are padded to 128 lanes (zero weights/biases), so
    # every bias-add / ReLU is lane-dense and the next matmul's K is aligned.
    h = jnp.maximum(
        jnp.dot(x_ref[...], w1_ref[...], preferred_element_type=jnp.float32)
        + b1_ref[...], 0.0)
    h = jnp.maximum(
        jnp.dot(h.astype(jnp.bfloat16), w2_ref[...],
                preferred_element_type=jnp.float32) + b2_ref[...], 0.0)
    shared = jnp.maximum(
        jnp.dot(h.astype(jnp.bfloat16), w3_ref[...],
                preferred_element_type=jnp.float32) + b3_ref[...], 0.0)

    # One lane-dense matmul for ALL head logits: (rows, 128) @ (128, pad).
    logits = (jnp.dot(shared.astype(jnp.bfloat16), wh_ref[...],
                      preferred_element_type=jnp.float32) + bh_ref[...])

    # Per-head activations on the FULL 128-lane slab using static lane masks;
    # masked reduces go through the XLU, everything stays in one vreg layout.
    lane = lax.broadcasted_iota(jnp.int32, logits.shape, 1)
    neg_big = jnp.float32(-1e30)
    result = jnp.zeros_like(logits)          # padded lanes stay 0
    for start, stop, act in segments:        # static (trace-time) segment list
        mask = (lane >= start) & (lane < stop)
        if act == "softmax":
            m = jnp.max(jnp.where(mask, logits, neg_big), axis=-1, keepdims=True)
            e = jnp.exp(jnp.where(mask, logits - m, neg_big))  # exp(-1e30) -> 0
            inv = pl.reciprocal(jnp.sum(e, axis=-1, keepdims=True), approx=True)
            seg = e * inv
        elif act == "relu":
            seg = jnp.maximum(logits, 0.0)
        else:  # sigmoid via EUP tanh: sigmoid(x) = 0.5*(tanh(x/2)+1)
            seg = 0.5 * (jnp.tanh(0.5 * logits) + 1.0)
        result = jnp.where(mask, seg, result)

    # Single full-width lane-dense store.
    out_ref[...] = result


# ----------------------------------------------------------------------------
# Parameter construction / packing
# ----------------------------------------------------------------------------
def init_linear(key, in_dim, out_dim):
    # Roughly matches PyTorch's uniform(-1/sqrt(in), 1/sqrt(in)) init.
    kw, kb = jax.random.split(key)
    bound = 1.0 / jnp.sqrt(jnp.float32(in_dim))
    w = jax.random.uniform(kw, (in_dim, out_dim), jnp.float32, -bound, bound)
    b = jax.random.uniform(kb, (1, out_dim), jnp.float32, -bound, bound)
    return w, b


def init_decoder_params(key, dim, in_out, discrete_features,
                        continuous_features, binary_features):
    h1, h2 = 20, 25
    keys = jax.random.split(key, 4)
    w1, b1 = init_linear(keys[0], dim, h1)
    w2, b2 = init_linear(keys[1], h1, h2)
    w3, b3 = init_linear(keys[2], h2, in_out)
    params = {"shared": {"w1": w1, "b1": b1, "w2": w2, "b2": b2,
                         "w3": w3, "b3": b3},
              "discrete": {}, "continuous": {}, "binary": {}}
    k = keys[3]
    for feature, num_classes in discrete_features.items():
        k, sub = jax.random.split(k)
        params["discrete"][feature] = init_linear(sub, in_out, num_classes)
    for feature in continuous_features:
        k, sub = jax.random.split(k)
        params["continuous"][feature] = init_linear(sub, in_out, 1)
    for feature in binary_features:
        k, sub = jax.random.split(k)
        params["binary"][feature] = init_linear(sub, in_out, 2)
    return params


def _pad2(a, rows, cols):
    return jnp.pad(a, ((0, rows - a.shape[0]), (0, cols - a.shape[1])))


def pack_decoder_params(params, discrete_features, continuous_features,
                        binary_features):
    """Pad trunk to 128 lanes and concatenate all head weights into one
    lane-dense matrix + a static segment table."""
    head_ws, head_bs, segments, slices = [], [], [], {}
    col = 0
    for feature, n in discrete_features.items():
        w, b = params["discrete"][feature]
        head_ws.append(w); head_bs.append(b)
        segments.append((col, col + n, "softmax"))        # per-head softmax
        slices[("discrete", feature)] = (col, col + n)
        col += n
    start = col
    for feature in continuous_features:
        w, b = params["continuous"][feature]
        head_ws.append(w); head_bs.append(b)
        slices[("continuous", feature)] = (col, col + 1)
        col += 1
    if continuous_features:
        segments.append((start, col, "relu"))             # elementwise -> merged
    start = col
    for feature in binary_features:
        w, b = params["binary"][feature]
        head_ws.append(w); head_bs.append(b)
        slices[("binary", feature)] = (col, col + 2)
        col += 2
    if binary_features:
        segments.append((start, col, "sigmoid"))          # elementwise -> merged

    total = col
    head_pad = _round_up(max(total, 1), LANE)

    sh = params["shared"]
    dim = sh["w1"].shape[0]
    h1 = sh["w1"].shape[1]
    h2 = sh["w2"].shape[1]
    in_out = sh["w3"].shape[1]
    h1p = _round_up(h1, LANE)
    h2p = _round_up(h2, LANE)
    iop = _round_up(in_out, LANE)

    w1 = _pad2(sh["w1"], dim, h1p)
    b1 = _pad2(sh["b1"], 1, h1p)
    w2 = _pad2(sh["w2"], h1p, h2p)
    b2 = _pad2(sh["b2"], 1, h2p)
    w3 = _pad2(sh["w3"], h2p, iop)
    b3 = _pad2(sh["b3"], 1, iop)
    wh = _pad2(jnp.concatenate(head_ws, axis=1), iop, head_pad)
    bh = _pad2(jnp.concatenate(head_bs, axis=1), 1, head_pad)

    return {
        "w1": w1.astype(jnp.bfloat16), "b1": b1,
        "w2": w2.astype(jnp.bfloat16), "b2": b2,
        "w3": w3.astype(jnp.bfloat16), "b3": b3,
        "wh": wh.astype(jnp.bfloat16), "bh": bh,
        "segments": tuple(segments), "slices": slices, "head_pad": head_pad,
    }


# ----------------------------------------------------------------------------
# Forward pass (one pallas_call)
# ----------------------------------------------------------------------------
def decoder_forward(packed, x):
    batch, dim = x.shape
    block_rows = _pick_block_rows(batch)
    padded_batch = _round_up(batch, block_rows)
    grid = (padded_batch // block_rows,)
    pad = packed["head_pad"]

    x = x.astype(jnp.bfloat16)                      # halve input DMA
    if padded_batch != batch:
        x = jnp.pad(x, ((0, padded_batch - batch), (0, 0)))

    weights = (packed["w1"], packed["b1"], packed["w2"], packed["b2"],
               packed["w3"], packed["b3"], packed["wh"], packed["bh"])

    row_spec = pl.BlockSpec((block_rows, dim), lambda i: (i, 0))
    out_spec = pl.BlockSpec((block_rows, pad), lambda i: (i, 0))
    weight_specs = [pl.BlockSpec(w.shape, lambda i: (0, 0)) for w in weights]

    slab = pl.pallas_call(
        functools.partial(decoder_fused_kernel, segments=packed["segments"]),
        out_shape=jax.ShapeDtypeStruct((padded_batch, pad), jnp.float32),
        grid=grid,
        in_specs=[row_spec] + weight_specs,
        out_specs=out_spec,
        compiler_params=pltpu.CompilerParams(
            dimension_semantics=("parallel",)),     # shards batch across TCs on v7x
    )(x, *weights)
    slab = slab[:batch]

    discrete_outputs, continuous_outputs, binary_outputs = {}, {}, {}
    for (kind, feature), (a, b) in packed["slices"].items():
        seg = slab[:, a:b]
        if kind == "discrete":
            discrete_outputs[feature] = seg
        elif kind == "continuous":
            continuous_outputs[feature] = seg
        else:
            binary_outputs[feature] = seg
    return discrete_outputs, continuous_outputs, binary_outputs


# ----------------------------------------------------------------------------
# Reference (pure JAX, same bf16 operand rounding) for a sanity check
# ----------------------------------------------------------------------------
def decoder_forward_ref(packed, x):
    def mm(a, w):
        return jnp.dot(a.astype(jnp.bfloat16), w,
                       preferred_element_type=jnp.float32)

    h = jnp.maximum(mm(x, packed["w1"]) + packed["b1"], 0.0)
    h = jnp.maximum(mm(h, packed["w2"]) + packed["b2"], 0.0)
    shared = jnp.maximum(mm(h, packed["w3"]) + packed["b3"], 0.0)
    logits = mm(shared, packed["wh"]) + packed["bh"]

    disc, cont, binr = {}, {}, {}
    for (kind, feature), (a, b) in packed["slices"].items():
        seg = logits[:, a:b]
        if kind == "discrete":
            disc[feature] = jax.nn.softmax(seg, axis=-1)
        elif kind == "continuous":
            cont[feature] = jnp.maximum(seg, 0.0)
        else:
            binr[feature] = jax.nn.sigmoid(seg)
    return disc, cont, binr


# TODO(synk): compute_loss (CrossEntropyLoss/MSELoss/BCELoss) is training-only
# and not part of the forward pass; it is not implemented as a Pallas kernel.

if __name__ == "__main__":
    batch = 16
    dim = 8        # latent dimension (Decoder input)
    in_out = 32    # shared-trunk output width
    discrete_features = {"proto": 3, "service": 5}
    continuous_features = ["duration", "bytes"]
    binary_features = ["is_attack"]

    key = jax.random.PRNGKey(0)
    k_params, k_x = jax.random.split(key)
    params = init_decoder_params(k_params, dim, in_out, discrete_features,
                                 continuous_features, binary_features)
    packed = pack_decoder_params(params, discrete_features,
                                 continuous_features, binary_features)
    x = jax.random.normal(k_x, (batch, dim), jnp.float32)

    out = decoder_forward(packed, x)
    out = jax.block_until_ready(out)

    ref = decoder_forward_ref(packed, x)
    for pallas_d, ref_d in zip(out, ref):
        for f in ref_d:
            assert pallas_d[f].shape == ref_d[f].shape, f
            assert jnp.allclose(pallas_d[f], ref_d[f], atol=5e-3, rtol=5e-3), f

    print("KERNEL_OK")
</pallas_src>

<mosaic_0001>
module attributes {stable_mosaic.version = 11 : i64} {
  func.func @decoder_fused_kernel(%arg0: i32, %arg1: memref<16x8xbf16, #tpu.memory_space<vmem>>, %arg2: memref<8x128xbf16, #tpu.memory_space<vmem>>, %arg3: memref<1x128xf32, #tpu.memory_space<vmem>>, %arg4: memref<128x128xbf16, #tpu.memory_space<vmem>>, %arg5: memref<1x128xf32, #tpu.memory_space<vmem>>, %arg6: memref<128x128xbf16, #tpu.memory_space<vmem>>, %arg7: memref<1x128xf32, #tpu.memory_space<vmem>>, %arg8: memref<128x128xbf16, #tpu.memory_space<vmem>>, %arg9: memref<1x128xf32, #tpu.memory_space<vmem>>, %arg10: memref<16x128xf32, #tpu.memory_space<vmem>>) attributes {dimension_semantics = [#tpu.dimension_semantics<parallel>], iteration_bounds = array<i64: 1>, scalar_prefetch = 0 : i64, scratch_operands = 0 : i64, tpu.core_type = #tpu.core_type<tc>, window_params = [{transform_indices = @transform_0, window_bounds = array<i64: 16, 8>}, {pipeline_mode = #tpu.pipeline_mode<synchronous>, transform_indices = @transform_1, window_bounds = array<i64: 8, 128>}, {pipeline_mode = #tpu.pipeline_mode<synchronous>, transform_indices = @transform_2, window_bounds = array<i64: 1, 128>}, {pipeline_mode = #tpu.pipeline_mode<synchronous>, transform_indices = @transform_3, window_bounds = array<i64: 128, 128>}, {pipeline_mode = #tpu.pipeline_mode<synchronous>, transform_indices = @transform_4, window_bounds = array<i64: 1, 128>}, {pipeline_mode = #tpu.pipeline_mode<synchronous>, transform_indices = @transform_5, window_bounds = array<i64: 128, 128>}, {pipeline_mode = #tpu.pipeline_mode<synchronous>, transform_indices = @transform_6, window_bounds = array<i64: 1, 128>}, {pipeline_mode = #tpu.pipeline_mode<synchronous>, transform_indices = @transform_7, window_bounds = array<i64: 128, 128>}, {pipeline_mode = #tpu.pipeline_mode<synchronous>, transform_indices = @transform_8, window_bounds = array<i64: 1, 128>}, {transform_indices = @transform_9, window_bounds = array<i64: 16, 128>}]} {
    %c0 = arith.constant 0 : index
    %c0_0 = arith.constant 0 : index
    %0 = vector.load %arg1[%c0, %c0_0] : memref<16x8xbf16, #tpu.memory_space<vmem>>, vector<16x8xbf16>
    %c0_1 = arith.constant 0 : index
    %c0_2 = arith.constant 0 : index
    %1 = vector.load %arg2[%c0_1, %c0_2] : memref<8x128xbf16, #tpu.memory_space<vmem>>, vector<8x128xbf16>
    %cst = arith.constant dense<0.000000e+00> : vector<16x128xf32>
    %2 = tpu.matmul %0, %1, %cst {dimension_numbers = #tpu.dot_dimension_numbers<[1], [0], [0], [1], [0, 0, 1, 1], [], []>} : vector<16x8xbf16>, vector<8x128xbf16>, vector<16x128xf32> -> vector<16x128xf32>
    %c0_3 = arith.constant 0 : index
    %c0_4 = arith.constant 0 : index
    %3 = vector.load %arg3[%c0_3, %c0_4] : memref<1x128xf32, #tpu.memory_space<vmem>>, vector<1x128xf32>
    %4 = vector.broadcast %3 : vector<1x128xf32> to vector<16x128xf32>
    %5 = arith.addf %2, %4 : vector<16x128xf32>
    %cst_5 = arith.constant 0.000000e+00 : f32
    %6 = vector.broadcast %cst_5 : f32 to vector<16x128xf32>
    %7 = arith.maximumf %5, %6 : vector<16x128xf32>
    %8 = arith.truncf %7 : vector<16x128xf32> to vector<16x128xbf16>
    %c0_6 = arith.constant 0 : index
    %c0_7 = arith.constant 0 : index
    %9 = vector.load %arg4[%c0_6, %c0_7] : memref<128x128xbf16, #tpu.memory_space<vmem>>, vector<128x128xbf16>
    %cst_8 = arith.constant dense<0.000000e+00> : vector<16x128xf32>
    %10 = tpu.matmul %8, %9, %cst_8 {dimension_numbers = #tpu.dot_dimension_numbers<[1], [0], [0], [1], [0, 0, 1, 1], [], []>} : vector<16x128xbf16>, vector<128x128xbf16>, vector<16x128xf32> -> vector<16x128xf32>
    %c0_9 = arith.constant 0 : index
    %c0_10 = arith.constant 0 : index
    %11 = vector.load %arg5[%c0_9, %c0_10] : memref<1x128xf32, #tpu.memory_space<vmem>>, vector<1x128xf32>
    %12 = vector.broadcast %11 : vector<1x128xf32> to vector<16x128xf32>
    %13 = arith.addf %10, %12 : vector<16x128xf32>
    %cst_11 = arith.constant 0.000000e+00 : f32
    %14 = vector.broadcast %cst_11 : f32 to vector<16x128xf32>
    %15 = arith.maximumf %13, %14 : vector<16x128xf32>
    %16 = arith.truncf %15 : vector<16x128xf32> to vector<16x128xbf16>
    %c0_12 = arith.constant 0 : index
    %c0_13 = arith.constant 0 : index
    %17 = vector.load %arg6[%c0_12, %c0_13] : memref<128x128xbf16, #tpu.memory_space<vmem>>, vector<128x128xbf16>
    %cst_14 = arith.constant dense<0.000000e+00> : vector<16x128xf32>
    %18 = tpu.matmul %16, %17, %cst_14 {dimension_numbers = #tpu.dot_dimension_numbers<[1], [0], [0], [1], [0, 0, 1, 1], [], []>} : vector<16x128xbf16>, vector<128x128xbf16>, vector<16x128xf32> -> vector<16x128xf32>
    %c0_15 = arith.constant 0 : index
    %c0_16 = arith.constant 0 : index
    %19 = vector.load %arg7[%c0_15, %c0_16] : memref<1x128xf32, #tpu.memory_space<vmem>>, vector<1x128xf32>
    %20 = vector.broadcast %19 : vector<1x128xf32> to vector<16x128xf32>
    %21 = arith.addf %18, %20 : vector<16x128xf32>
    %cst_17 = arith.constant 0.000000e+00 : f32
    %22 = vector.broadcast %cst_17 : f32 to vector<16x128xf32>
    %23 = arith.maximumf %21, %22 : vector<16x128xf32>
    %24 = arith.truncf %23 : vector<16x128xf32> to vector<16x128xbf16>
    %c0_18 = arith.constant 0 : index
    %c0_19 = arith.constant 0 : index
    %25 = vector.load %arg8[%c0_18, %c0_19] : memref<128x128xbf16, #tpu.memory_space<vmem>>, vector<128x128xbf16>
    %cst_20 = arith.constant dense<0.000000e+00> : vector<16x128xf32>
    %26 = tpu.matmul %24, %25, %cst_20 {dimension_numbers = #tpu.dot_dimension_numbers<[1], [0], [0], [1], [0, 0, 1, 1], [], []>} : vector<16x128xbf16>, vector<128x128xbf16>, vector<16x128xf32> -> vector<16x128xf32>
    %c0_21 = arith.constant 0 : index
    %c0_22 = arith.constant 0 : index
    %27 = vector.load %arg9[%c0_21, %c0_22] : memref<1x128xf32, #tpu.memory_space<vmem>>, vector<1x128xf32>
    %28 = vector.broadcast %27 : vector<1x128xf32> to vector<16x128xf32>
    %29 = arith.addf %26, %28 : vector<16x128xf32>
    %30 = tpu.iota {dimensions = array<i32: 1>} : vector<16x128xi32>
    %cst_23 = arith.constant 0.000000e+00 : f32
    %31 = vector.broadcast %cst_23 : f32 to vector<16x128xf32>
    %c0_i32 = arith.constant 0 : i32
    %32 = vector.broadcast %c0_i32 : i32 to vector<16x128xi32>
    %33 = arith.cmpi sge, %30, %32 : vector<16x128xi32>
    %c3_i32 = arith.constant 3 : i32
    %34 = vector.broadcast %c3_i32 : i32 to vector<16x128xi32>
    %35 = arith.cmpi slt, %30, %34 : vector<16x128xi32>
    %36 = arith.andi %33, %35 : vector<16x128xi1>
    %cst_24 = arith.constant -1.000000e+30 : f32
    %37 = vector.broadcast %cst_24 : f32 to vector<16x128xf32>
    %38 = arith.select %36, %29, %37 : vector<16x128xi1>, vector<16x128xf32>
    %cst_25 = arith.constant dense<0xFF800000> : vector<16xf32>
    %39 = vector.multi_reduction <maximumf>, %38, %cst_25 [1] : vector<16x128xf32> to vector<16xf32>
    %40 = vector.shape_cast %39 : vector<16xf32> to vector<16x1xf32>
    %41 = vector.broadcast %40 : vector<16x1xf32> to vector<16x128xf32>
    %42 = arith.subf %29, %41 : vector<16x128xf32>
    %cst_26 = arith.constant -1.000000e+30 : f32
    %43 = vector.broadcast %cst_26 : f32 to vector<16x128xf32>
    %44 = arith.select %36, %42, %43 : vector<16x128xi1>, vector<16x128xf32>
    %45 = math.exp %44 : vector<16x128xf32>
    %cst_27 = arith.constant dense<0.000000e+00> : vector<16xf32>
    %46 = vector.multi_reduction <add>, %45, %cst_27 [1] : vector<16x128xf32> to vector<16xf32>
    %47 = vector.shape_cast %46 : vector<16xf32> to vector<16x1xf32>
    %48 = tpu.reciprocal %47 {approx = true} : vector<16x1xf32> -> vector<16x1xf32>
    %49 = vector.broadcast %48 : vector<16x1xf32> to vector<16x128xf32>
    %50 = arith.mulf %45, %49 : vector<16x128xf32>
    %51 = arith.select %36, %50, %31 : vector<16x128xi1>, vector<16x128xf32>
    %c3_i32_28 = arith.constant 3 : i32
    %52 = vector.broadcast %c3_i32_28 : i32 to vector<16x128xi32>
    %53 = arith.cmpi sge, %30, %52 : vector<16x128xi32>
    %c8_i32 = arith.constant 8 : i32
    %54 = vector.broadcast %c8_i32 : i32 to vector<16x128xi32>
    %55 = arith.cmpi slt, %30, %54 : vector<16x128xi32>
    %56 = arith.andi %53, %55 : vector<16x128xi1>
    %cst_29 = arith.constant -1.000000e+30 : f32
    %57 = vector.broadcast %cst_29 : f32 to vector<16x128xf32>
    %58 = arith.select %56, %29, %57 : vector<16x128xi1>, vector<16x128xf32>
    %cst_30 = arith.constant dense<0xFF800000> : vector<16xf32>
    %59 = vector.multi_reduction <maximumf>, %58, %cst_30 [1] : vector<16x128xf32> to vector<16xf32>
    %60 = vector.shape_cast %59 : vector<16xf32> to vector<16x1xf32>
    %61 = vector.broadcast %60 : vector<16x1xf32> to vector<16x128xf32>
    %62 = arith.subf %29, %61 : vector<16x128xf32>
    %cst_31 = arith.constant -1.000000e+30 : f32
    %63 = vector.broadcast %cst_31 : f32 to vector<16x128xf32>
    %64 = arith.select %56, %62, %63 : vector<16x128xi1>, vector<16x128xf32>
    %65 = math.exp %64 : vector<16x128xf32>
    %cst_32 = arith.constant dense<0.000000e+00> : vector<16xf32>
    %66 = vector.multi_reduction <add>, %65, %cst_32 [1] : vector<16x128xf32> to vector<16xf32>
    %67 = vector.shape_cast %66 : vector<16xf32> to vector<16x1xf32>
    %68 = tpu.reciprocal %67 {approx = true} : vector<16x1xf32> -> vector<16x1xf32>
    %69 = vector.broadcast %68 : vector<16x1xf32> to vector<16x128xf32>
    %70 = arith.mulf %65, %69 : vector<16x128xf32>
    %71 = arith.select %56, %70, %51 : vector<16x128xi1>, vector<16x128xf32>
    %c8_i32_33 = arith.constant 8 : i32
    %72 = vector.broadcast %c8_i32_33 : i32 to vector<16x128xi32>
    %73 = arith.cmpi sge, %30, %72 : vector<16x128xi32>
    %c10_i32 = arith.constant 10 : i32
    %74 = vector.broadcast %c10_i32 : i32 to vector<16x128xi32>
    %75 = arith.cmpi slt, %30, %74 : vector<16x128xi32>
    %76 = arith.andi %73, %75 : vector<16x128xi1>
    %cst_34 = arith.constant 0.000000e+00 : f32
    %77 = vector.broadcast %cst_34 : f32 to vector<16x128xf32>
    %78 = arith.maximumf %29, %77 : vector<16x128xf32>
    %79 = arith.select %76, %78, %71 : vector<16x128xi1>, vector<16x128xf32>
    %c10_i32_35 = arith.constant 10 : i32
    %80 = vector.broadcast %c10_i32_35 : i32 to vector<16x128xi32>
    %81 = arith.cmpi sge, %30, %80 : vector<16x128xi32>
    %c12_i32 = arith.constant 12 : i32
    %82 = vector.broadcast %c12_i32 : i32 to vector<16x128xi32>
    %83 = arith.cmpi slt, %30, %82 : vector<16x128xi32>
    %84 = arith.andi %81, %83 : vector<16x128xi1>
    %cst_36 = arith.constant 5.000000e-01 : f32
    %85 = vector.broadcast %cst_36 : f32 to vector<16x128xf32>
    %86 = arith.mulf %85, %29 : vector<16x128xf32>
    %87 = math.tanh %86 : vector<16x128xf32>
    %cst_37 = arith.constant 1.000000e+00 : f32
    %88 = vector.broadcast %cst_37 : f32 to vector<16x128xf32>
    %89 = arith.addf %87, %88 : vector<16x128xf32>
    %cst_38 = arith.constant 5.000000e-01 : f32
    %90 = vector.broadcast %cst_38 : f32 to vector<16x128xf32>
    %91 = arith.mulf %90, %89 : vector<16x128xf32>
    %92 = arith.select %84, %91, %79 : vector<16x128xi1>, vector<16x128xf32>
    %c0_39 = arith.constant 0 : index
    %c0_40 = arith.constant 0 : index
    %93 = vector.load %arg10[%c0_39, %c0_40] : memref<16x128xf32, #tpu.memory_space<vmem>>, vector<16x128xf32>
    tpu.vector_store %arg10[%c0_39, %c0_40], %92 {strides = array<i32>} : memref<16x128xf32, #tpu.memory_space<vmem>>, vector<16x128xf32>,
    return
  }
  func.func @transform_0(%arg0: i32) -> (i32, i32) {
    %c0_i32 = arith.constant 0 : i32
    %c0_i32_0 = arith.constant 0 : i32
    return %arg0, %c0_i32 : i32, i32
  }
  func.func @transform_1(%arg0: i32) -> (i32, i32) {
    %c0_i32 = arith.constant 0 : i32
    %c0_i32_0 = arith.constant 0 : i32
    %c0_i32_1 = arith.constant 0 : i32
    return %c0_i32, %c0_i32_0 : i32, i32
  }
  func.func @transform_2(%arg0: i32) -> (i32, i32) {
    %c0_i32 = arith.constant 0 : i32
    %c0_i32_0 = arith.constant 0 : i32
    %c0_i32_1 = arith.constant 0 : i32
    return %c0_i32, %c0_i32_0 : i32, i32
  }
  func.func @transform_3(%arg0: i32) -> (i32, i32) {
    %c0_i32 = arith.constant 0 : i32
    %c0_i32_0 = arith.constant 0 : i32
    %c0_i32_1 = arith.constant 0 : i32
    return %c0_i32, %c0_i32_0 : i32, i32
  }
  func.func @transform_4(%arg0: i32) -> (i32, i32) {
    %c0_i32 = arith.constant 0 : i32
    %c0_i32_0 = arith.constant 0 : i32
    %c0_i32_1 = arith.constant 0 : i32
    return %c0_i32, %c0_i32_0 : i32, i32
  }
  func.func @transform_5(%arg0: i32) -> (i32, i32) {
    %c0_i32 = arith.constant 0 : i32
    %c0_i32_0 = arith.constant 0 : i32
    %c0_i32_1 = arith.constant 0 : i32
    return %c0_i32, %c0_i32_0 : i32, i32
  }
  func.func @transform_6(%arg0: i32) -> (i32, i32) {
    %c0_i32 = arith.constant 0 : i32
    %c0_i32_0 = arith.constant 0 : i32
    %c0_i32_1 = arith.constant 0 : i32
    return %c0_i32, %c0_i32_0 : i32, i32
  }
  func.func @transform_7(%arg0: i32) -> (i32, i32) {
    %c0_i32 = arith.constant 0 : i32
    %c0_i32_0 = arith.constant 0 : i32
    %c0_i32_1 = arith.constant 0 : i32
    return %c0_i32, %c0_i32_0 : i32, i32
  }
  func.func @transform_8(%arg0: i32) -> (i32, i32) {
    %c0_i32 = arith.constant 0 : i32
    %c0_i32_0 = arith.constant 0 : i32
    %c0_i32_1 = arith.constant 0 : i32
    return %c0_i32, %c0_i32_0 : i32, i32
  }
  func.func @transform_9(%arg0: i32) -> (i32, i32) {
    %c0_i32 = arith.constant 0 : i32
    %c0_i32_0 = arith.constant 0 : i32
    return %arg0, %c0_i32 : i32, i32
  }
}

</mosaic_0001>

<bundles_post_ra>
// kernel: tpu_custom_call.1
= control target key start
LH: loop header
LB: loop body
LE: loop exit
PB: predicated region body
PF: predicated region fallthrough
CT: control target
= control target key end

     0   :  { %14 = vsyncpa [#allocation3], 0  ;;  %s1098_s0 = inlined_call_operand.vmem [shape: bf16[16,8], index: 0, kind: input, shape index: {}]   ;;  %s1099_s1 = inlined_call_operand.vmem [shape: bf16[8,128], index: 1, kind: input, shape index: {}]   ;;  %s1100_s2 = inlined_call_operand.vmem [shape: f32[1,128], index: 2, kind: input, shape index: {}]   ;;  %s1101_s3 = inlined_call_operand.hbm [shape: bf16[128,128], index: 3, kind: input, shape index: {}]   ;;  %s1102_s4 = inlined_call_operand.vmem [shape: f32[1,128], index: 4, kind: input, shape index: {}]   ;;  %s1103_s5 = inlined_call_operand.hbm [shape: bf16[128,128], index: 5, kind: input, shape index: {}]   ;;  %s1104_s6 = inlined_call_operand.vmem [shape: f32[1,128], index: 6, kind: input, shape index: {}]   ;;  %s1105_s7 = inlined_call_operand.hbm [shape: bf16[128,128], index: 7, kind: input, shape index: {}]   ;;  %s1106_s8 = inlined_call_operand.vmem [shape: f32[1,128], index: 8, kind: input, shape index: {}]   ;;  %s1107_s9 = inlined_call_operand.hbm [shape: f32[16,128], index: 9, kind: output, shape index: {}]  }
   0x1   :  { %15 = vsyncpa [#allocation6], 0 }
   0x2   :  { %16 = vsyncpa [#allocation4], 0  ;;  %s854_s30 = smov [#allocation5]   ;;  %s855_s11 = smov [#allocation2]  }
   0x3   :  { %s42_s10 = sshll.u32 %s854_s30, 4  ;;  %s28_s12 = sshll.u32 %s855_s11, 4  ;;  %s43_s10 = int_to_ptr.vmem [resolvable:$true] %s42_s10  ;;  %s914_s12 = int_to_ptr.vmem [resolvable:$true] %s28_s12 }
   0x4   :  { %s760_s15 = scalar_lea.hbm %s1103_s5, 1024 }
   0x5   :  { %p761_p0 = scmp.ne.s32.totalorder %s1103_s5, %s760_s15  ;;  %p764_p1 = scmp.lt.u32.totalorder %s760_s15, %s1103_s5 }
   0x7   :  { %p766_p2 = pnand %p764_p1, %p761_p0 }
   0x9   :  { %769 = shalt.err (!%p766_p2)
}
   0xa   :  { %s770_s20 = scalar_lea.vmem %s43_s10, 1024  ;;  %p775_p4 = scmp.lt.s32.totalorder %s43_s10, %s43_s10 }
   0xb   :  { %p771_p3 = scmp.ne.s32.totalorder %s43_s10, %s770_s20  ;;  %p776_p5 = scmp.lt.s32.totalorder %s770_s20, %s770_s20 }
   0xd   :  { %p777_p6 = por %p776_p5, %p775_p4 }
   0xf   :  { %p778_p7 = pnand %p777_p6, %p771_p3 }
  0x11   :  { %781 = shalt.err (!%p778_p7)
}
  0x12   :  { %s856_s21 = smov 64   ;;  %s857_s22 = smov 4  }
  0x13   :  { %48 = dma.hbm_to_vmem [thread:$0]  %s1103_s5, 1024, %s43_s10, [#allocation6], %s856_s21, %s856_s21, %s857_s22  }
  0x14   :  { %s782_s27 = scalar_lea.hbm %s1101_s3, 1024 }
  0x15   :  { %p783_p8 = scmp.ne.s32.totalorder %s1101_s3, %s782_s27  ;;  %p786_p9 = scmp.lt.u32.totalorder %s782_s27, %s1101_s3 }
  0x17   :  { %p788_p10 = pnand %p786_p9, %p783_p8 }
  0x19   :  { %791 = shalt.err (!%p788_p10)
}
  0x1a   :  { %s792_s13 = scalar_lea.vmem %s914_s12, 1024  ;;  %p797_p12 = scmp.lt.s32.totalorder %s914_s12, %s914_s12 }
  0x1b   :  { %p793_p11 = scmp.ne.s32.totalorder %s914_s12, %s792_s13  ;;  %p798_p13 = scmp.lt.s32.totalorder %s792_s13, %s792_s13 }
  0x1d   :  { %p799_p0 = por %p798_p13, %p797_p12 }
  0x1f   :  { %p800_p1 = pnand %p799_p0, %p793_p11 }
  0x21   :  { %803 = shalt.err (!%p800_p1)
}
  0x22   :  { %34 = dma.hbm_to_vmem [thread:$0]  %s1101_s3, 1024, %s914_s12, [#allocation3], %s856_s21, %s856_s21, %s857_s22  }
  0x23   :  { %s858_s14 = smov [#allocation7]   ;;  %s804_s18 = scalar_lea.hbm %s1105_s7, 1024 }
  0x24   :  { %s56_s15 = sshll.u32 %s858_s14, 4  ;;  %p805_p2 = scmp.ne.s32.totalorder %s1105_s7, %s804_s18  ;;  %s57_s15 = int_to_ptr.vmem [resolvable:$true] %s56_s15 }
  0x25   :  { %p808_p3 = scmp.lt.u32.totalorder %s804_s18, %s1105_s7 }
  0x27   :  { %p810_p4 = pnand %p808_p3, %p805_p2 }
  0x29   :  { %813 = shalt.err (!%p810_p4)
}
  0x2a   :  { %s814_s25 = scalar_lea.vmem %s57_s15, 1024  ;;  %p819_p6 = scmp.lt.s32.totalorder %s57_s15, %s57_s15 }
  0x2b   :  { %p815_p5 = scmp.ne.s32.totalorder %s57_s15, %s814_s25  ;;  %p820_p7 = scmp.lt.s32.totalorder %s814_s25, %s814_s25 }
  0x2d   :  { %p821_p8 = por %p820_p7, %p819_p6 }
  0x2f   :  { %p822_p9 = pnand %p821_p8, %p815_p5 }
  0x31   :  { %825 = shalt.err (!%p822_p9)
}
  0x32   :  { %62 = dma.hbm_to_vmem [thread:$0]  %s1105_s7, 1024, %s57_s15, [#allocation6], %s856_s21, %s856_s21, %s857_s22  }
  0x33   :  { %848 = dma.done.wait [#allocation3], 1024  }
  0x34   :  { %849 = vsyncadd [#allocation3], 4294966272 }
  0x35   :  { %850 = dma.done.wait [#allocation6], 2048  }
  0x36   :  { %851 = vsyncadd [#allocation6], 4294965248  ;;  %v859_v0 = vmov 0.0   ;;  %vm860_vm0 = vmmov 0   ;;  %vm94_vm1 = vcmask 1043456   ;;  %v715_v3 = vld [vmem:[%s1098_s0] sm:$0xff]   ;;  %v484_v58 = vlaneseq }
  0x37   :  { %639 = vmatprep.subr.bf16.mxu0 %v859_v0  ;;  %641 = vmatprep.mubr.msk.bf16.mxu0 %vm860_vm0, %v859_v0  ;;  %v77_v1 = vld [vmem:[%s1099_s1] sm:$0xf]  ;;  %vm90_vm2 = vcmask 64512   ;;  %v716_v4 = vld [vmem:[#allocation2] sm:$0xff]   ;;  %v717_v5 = vld [vmem:[#allocation2 + $0x8] sm:$0xff]  }
  0x38   :  { %645 = vmatprep.subr.bf16.mxu1 %v859_v0  ;;  %661 = vmatprep.mubr.msk.bf16.mxu1 %vm860_vm0, %v859_v0  ;;  %v96_v2 = vsel %vm94_vm1, %v77_v1, 0  ;;  %v718_v6 = vld [vmem:[#allocation2 + $0x10] sm:$0xff]   ;;  %v719_v7 = vld [vmem:[#allocation2 + $0x18] sm:$0xff]   ;;  %v720_v8 = vld [vmem:[#allocation2 + $0x20] sm:$0xff]   ;;  %v1014_v59 = vand.u32 127, %v484_v58 }
  0x39   :  { %640 = vmatpush3.bf16.msra.mxu0 %v96_v2  ;;  %646 = vmatpush3.bf16.msra.mxu1 %v716_v4  ;;  %v721_v9 = vld [vmem:[#allocation2 + $0x28] sm:$0xff]   ;;  %v722_v10 = vld [vmem:[#allocation2 + $0x30] sm:$0xff]   ;;  %v723_v11 = vld [vmem:[#allocation2 + $0x38] sm:$0xff]  }
  0x3a   :  { %665 = vmatprep.subr.bf16.mxu0 %v859_v0  ;;  %647 = vmatprep.subr.bf16.mxu1 %v859_v0  ;;  %v724_v12 = vld [vmem:[#allocation5] sm:$0xff]   ;;  %v725_v13 = vld [vmem:[#allocation5 + $0x8] sm:$0xff]   ;;  %v726_v14 = vld [vmem:[#allocation5 + $0x10] sm:$0xff]   ;;  %vm513_vm3 = vcmp.ge.s32.totalorder %v1014_v59, 3  ;;  %vm514_vm4 = vcmp.lt.s32.totalorder %v1014_v59, 8  ;;  %vm487_vm6 = vcmp.lt.s32.totalorder %v1014_v59, 3 }
  0x3b   :  { %v727_v15 = vld [vmem:[#allocation5 + $0x18] sm:$0xff]   ;;  %v728_v16 = vld [vmem:[#allocation5 + $0x20] sm:$0xff]   ;;  %v729_v17 = vld [vmem:[#allocation5 + $0x28] sm:$0xff]   ;;  %vm540_vm7 = vcmp.ge.s32.totalorder %v1014_v59, 8  ;;  %vm541_vm8 = vcmp.lt.s32.totalorder %v1014_v59, 10  ;;  %vm547_vm9 = vcmp.ge.s32.totalorder %v1014_v59, 10 }
  0x3c   :  { %642 = vmatmul.mubr.msk.bf16.vlgmr.msra.gmra.mrb[0].mxu0 %vm90_vm2, %v715_v3  ;;  %v580_v18 = vld [vmem:[%s1100_s2] ss:$0 sm:$0xff]  ;;  %v731_v29 = vld [vmem:[#allocation5 + $0x38] sm:$0xff]   ;;  %v732_v30 = vld [vmem:[#allocation7] sm:$0xff]   ;;  %vm548_vm10 = vcmp.lt.s32.totalorder %v1014_v59, 12 }
  0x3d   :  { %681 = vmatprep.mubr.msk.bf16.mxu0 %vm860_vm0, %v859_v0  ;;  %648 = vmatpush3.bf16.msra.mxu1 %v717_v5  ;;  %v730_v28 = vld [vmem:[#allocation5 + $0x30] sm:$0xff]   ;;  %v733_v31 = vld [vmem:[#allocation7 + $0x8] sm:$0xff]   ;;  %v735_v33 = vld [vmem:[#allocation7 + $0x18] sm:$0xff]  }
  0x3e   :  { %649 = vmatprep.subr.bf16.mxu1 %v859_v0  ;;  %666 = vmatpush3.bf16.msra.mxu0 %v724_v12  ;;  %v734_v32 = vld [vmem:[#allocation7 + $0x10] sm:$0xff]   ;;  %v736_v34 = vld [vmem:[#allocation7 + $0x20] sm:$0xff]   ;;  %v737_v35 = vld [vmem:[#allocation7 + $0x28] sm:$0xff]  }
  0x3f   :  { %667 = vmatprep.subr.bf16.mxu0 %v859_v0  ;;  %v583_v36 = vld [vmem:[%s1102_s4] ss:$0 sm:$0xff]  ;;  %v739_v47 = vld [vmem:[#allocation7 + $0x38] sm:$0xff]   ;;  %vm1021_vm5 = vmand %vm513_vm3, %vm514_vm4 }
  0x40   :  { %v738_v46 = vld [vmem:[#allocation7 + $0x30] sm:$0xff]   ;;  %vm1060_vm11 = vmand %vm540_vm7, %vm541_vm8 }
  0x41   :  { %650 = vmatpush3.bf16.msra.mxu1 %v718_v6  ;;  %v592_v48 = vld [vmem:[%s1104_s6] ss:$0 sm:$0xff]  ;;  %vm1067_vm12 = vmand %vm547_vm9, %vm548_vm10  ;;  %s861_s6 = smov [#allocation8]  }
  0x42   :  { %651 = vmatprep.subr.bf16.mxu1 %v859_v0  ;;  %668 = vmatpush3.bf16.msra.mxu0 %v725_v13  ;;  %v601_v60 = vld [vmem:[%s1106_s8] ss:$0 sm:$0xff]  ;;  %s567_s8 = sshll.u32 %s861_s6, 4  ;;  %s568_s8 = int_to_ptr.vmem [resolvable:$true] %s567_s8 }
  0x43   :  { %669 = vmatprep.subr.bf16.mxu0 %v859_v0  ;;  %s826_s11 = scalar_lea.vmem %s568_s8, 256  ;;  %p831_p11 = scmp.lt.s32.totalorder %s568_s8, %s568_s8 }
  0x44   :  { %p827_p10 = scmp.ne.s32.totalorder %s568_s8, %s826_s11  ;;  %p832_p12 = scmp.lt.s32.totalorder %s826_s11, %s826_s11 }
  0x45   :  { %652 = vmatpush3.bf16.msra.mxu1 %v719_v7 }
  0x46   :  { %653 = vmatprep.subr.bf16.mxu1 %v859_v0  ;;  %670 = vmatpush3.bf16.msra.mxu0 %v726_v14  ;;  %p833_p13 = por %p832_p12, %p831_p11 }
  0x47   :  { %671 = vmatprep.subr.bf16.mxu0 %v859_v0 }
  0x48   :  { %p834_p0 = pnand %p833_p13, %p827_p10 }
  0x49   :  { %654 = vmatpush3.bf16.msra.mxu1 %v720_v8 }
  0x4a   :  { %655 = vmatprep.subr.bf16.mxu1 %v859_v0  ;;  %672 = vmatpush3.bf16.msra.mxu0 %v727_v15 }
  0x4b   :  { %673 = vmatprep.subr.bf16.mxu0 %v859_v0 }
  0x4d   :  { %656 = vmatpush3.bf16.msra.mxu1 %v721_v9 }
  0x4e   :  { %657 = vmatprep.subr.bf16.mxu1 %v859_v0  ;;  %674 = vmatpush3.bf16.msra.mxu0 %v728_v16 }
  0x4f   :  { %675 = vmatprep.subr.bf16.mxu0 %v859_v0 }
  0x51   :  { %658 = vmatpush3.bf16.msra.mxu1 %v722_v10 }
  0x52   :  { %659 = vmatprep.subr.bf16.mxu1 %v859_v0  ;;  %676 = vmatpush3.bf16.msra.mxu0 %v729_v17 }
  0x53   :  { %677 = vmatprep.subr.bf16.mxu0 %v859_v0 }
  0x55   :  { %660 = vmatpush3.bf16.msra.mxu1 %v723_v11 }
  0x56   :  { %685 = vmatprep.subr.bf16.mxu1 %v859_v0  ;;  %678 = vmatpush3.bf16.msra.mxu0 %v730_v28 }
  0x57   :  { %679 = vmatprep.subr.bf16.mxu0 %v859_v0 }
  0x5a   :  { %680 = vmatpush3.bf16.msra.mxu0 %v731_v29 }
 0x10f   :  { %v132_v19 = vpop.f32.mrb[0].mxu0 }
 0x110   :  { %v133_v20 = vadd.f32 %v580_v18, %v132_v19  ;;  %v643_v21 = vpop.f32.mrb[1].mxu0 }
 0x111   :  { %v135_v22 = vpop.f32.mrb[2].mxu0 }
 0x112   :  { %v136_v23 = vadd.f32 %v580_v18, %v135_v22  ;;  %v644_v24 = vpop.f32.mrb[3].mxu0  ;;  %v139_v25 = vmax.f32 %v133_v20, 0.0 }
 0x114   :  { %v140_v26 = vmax.f32 %v136_v23, 0.0 }
 0x116   :  { %v141_v27 = vpack.c.bf16 %v140_v26, %v139_v25 }
 0x118   :  { %662 = vmatmul.mubr.bf16.vlgmr.msra.gmra.mrb[0].mxu1 %v141_v27 }
 0x119   :  { %701 = vmatprep.mubr.msk.bf16.mxu1 %vm860_vm0, %v859_v0  ;;  %686 = vmatpush3.bf16.msra.mxu1 %v732_v30 }
 0x11a   :  { %687 = vmatprep.subr.bf16.mxu1 %v859_v0 }
 0x11d   :  { %688 = vmatpush3.bf16.msra.mxu1 %v733_v31 }
 0x11e   :  { %689 = vmatprep.subr.bf16.mxu1 %v859_v0 }
 0x121   :  { %690 = vmatpush3.bf16.msra.mxu1 %v734_v32 }
 0x122   :  { %691 = vmatprep.subr.bf16.mxu1 %v859_v0 }
 0x125   :  { %692 = vmatpush3.bf16.msra.mxu1 %v735_v33 }
 0x126   :  { %693 = vmatprep.subr.bf16.mxu1 %v859_v0 }
 0x129   :  { %694 = vmatpush3.bf16.msra.mxu1 %v736_v34 }
 0x12a   :  { %695 = vmatprep.subr.bf16.mxu1 %v859_v0 }
 0x12d   :  { %696 = vmatpush3.bf16.msra.mxu1 %v737_v35 }
 0x12e   :  { %697 = vmatprep.subr.bf16.mxu1 %v859_v0 }
 0x131   :  { %698 = vmatpush3.bf16.msra.mxu1 %v738_v46 }
 0x132   :  { %699 = vmatprep.subr.bf16.mxu1 %v859_v0 }
 0x135   :  { %700 = vmatpush3.bf16.msra.mxu1 %v739_v47 }
 0x1eb   :  { %v247_v37 = vpop.f32.mrb[0].mxu1 }
 0x1ec   :  { %v248_v38 = vadd.f32 %v583_v36, %v247_v37  ;;  %v663_v39 = vpop.f32.mrb[1].mxu1 }
 0x1ed   :  { %v250_v40 = vpop.f32.mrb[2].mxu1 }
 0x1ee   :  { %v251_v41 = vadd.f32 %v583_v36, %v250_v40  ;;  %v664_v42 = vpop.f32.mrb[3].mxu1  ;;  %v254_v43 = vmax.f32 %v248_v38, 0.0 }
 0x1f0   :  { %v255_v44 = vmax.f32 %v251_v41, 0.0 }
 0x1f2   :  { %v256_v45 = vpack.c.bf16 %v255_v44, %v254_v43 }
 0x1f4   :  { %682 = vmatmul.mubr.bf16.vlgmr.msra.gmra.mrb[4].mxu0 %v256_v45 }
 0x2c7   :  { %v362_v49 = vpop.f32.mrb[4].mxu0 }
 0x2c8   :  { %v363_v50 = vadd.f32 %v592_v48, %v362_v49  ;;  %v683_v51 = vpop.f32.mrb[5].mxu0 }
 0x2c9   :  { %v365_v52 = vpop.f32.mrb[6].mxu0 }
 0x2ca   :  { %v366_v53 = vadd.f32 %v592_v48, %v365_v52  ;;  %v684_v54 = vpop.f32.mrb[7].mxu0  ;;  %v369_v55 = vmax.f32 %v363_v50, 0.0 }
 0x2cc   :  { %v370_v56 = vmax.f32 %v366_v53, 0.0 }
 0x2ce   :  { %v371_v57 = vpack.c.bf16 %v370_v56, %v369_v55 }
 0x2d0   :  { %702 = vmatmul.mubr.bf16.vlgmr.msra.gmra.mrb[4].mxu1 %v371_v57 }
 0x3a3   :  { %v477_v61 = vpop.f32.mrb[4].mxu1 }
 0x3a4   :  { %v1026_v63 = vadd.f32 %v601_v60, %v477_v61  ;;  %v703_v0 = vpop.f32.mrb[5].mxu1 }
 0x3a5   :  { %v480_v1 = vpop.f32.mrb[6].mxu1 }
 0x3a6   :  { %v1028_v2 = vadd.f32 %v601_v60, %v480_v1  ;;  %v704_v3 = vpop.f32.mrb[7].mxu1  ;;  %v516_v4 = vsel %vm1021_vm5, %v1026_v63, -1e+30  ;;  %v489_v5 = vsel %vm487_vm6, %v1026_v63, -1e+30  ;;  %v550_v28 = vmul.f32 0.5, %v1026_v63 }
 0x3a7   :  { %518 = vmax.xlane.f32.xlu1 %v516_v4  ;;  %491 = vmax.xlane.f32.xlu0 %v489_v5  ;;  %v543_v45 = vmax.f32 %v1026_v63, 0.0 }
 0x3a8   :  { %v517_v6 = vsel %vm1021_vm5, %v1028_v2, -1e+30  ;;  %v490_v7 = vsel %vm487_vm6, %v1028_v2, -1e+30  ;;  %v551_v30 = vmul.f32 0.5, %v1028_v2  ;;  %v544_v54 = vmax.f32 %v1028_v2, 0.0 }
 0x3ab   :  { %520 = vmax.xlane.f32.xlu1 %v517_v6  ;;  %493 = vmax.xlane.f32.xlu0 %v490_v7 }
 0x434   :  { %v519_v8 = vpop.xlane.xlu1 %518  ;;  %v492_v9 = vpop.xlane.xlu0 %491 }
 0x435   :  { %v522_v10 = vsub.f32 %v1026_v63, %v519_v8  ;;  %v495_v11 = vsub.f32 %v1026_v63, %v492_v9 }
 0x437   :  { %v524_v12 = vsel %vm1021_vm5, %v522_v10, -1e+30  ;;  %v497_v13 = vsel %vm487_vm6, %v495_v11, -1e+30 }
 0x438   :  { %v499_v14 = vmul.f32 1.442695, %v497_v13  ;;  %v521_v15 = vpop.xlane.xlu1 %520  ;;  %v494_v16 = vpop.xlane.xlu0 %493  ;;  %v526_v19 = vmul.f32 1.442695, %v524_v12 }
 0x439   :  { %v523_v17 = vsub.f32 %v1028_v2, %v521_v15  ;;  %v496_v18 = vsub.f32 %v1028_v2, %v494_v16 }
 0x43a   :  { %740 = vpow2.f32 %v499_v14 }
 0x43b   :  { %v498_v20 = vsel %vm487_vm6, %v496_v18, -1e+30  ;;  %v525_v21 = vsel %vm1021_vm5, %v523_v17, -1e+30  ;;  %742 = vpow2.f32 %v526_v19 }
 0x43c   :  { %v501_v22 = vmul.f32 1.442695, %v498_v20  ;;  %v528_v23 = vmul.f32 1.442695, %v525_v21 }
 0x43e   :  { %744 = vpow2.f32 %v501_v22 }
 0x43f   :  { %746 = vpow2.f32 %v528_v23 }
 0x444   :  { %v741_v24 = vpop.eup %740 }
 0x445   :  { %503 = vadd.xlane.f32.xlu0 %v741_v24  ;;  %v743_v25 = vpop.eup %742 }
 0x448   :  { %v745_v26 = vpop.eup %744 }
 0x449   :  { %530 = vadd.xlane.f32.xlu0 %v743_v25  ;;  %505 = vadd.xlane.f32.xlu1 %v745_v26  ;;  %v747_v27 = vpop.eup %746 }
 0x44d   :  { %532 = vadd.xlane.f32.xlu1 %v747_v27 }
 0x4d2   :  { %v504_v29 = vpop.xlane.xlu0 %503 }
 0x4d3   :  { %748 = vrcp.f32 %v504_v29 }
 0x4d4   :  { %750 = vtanh.f32 %v550_v28 }
 0x4d5   :  { %752 = vtanh.f32 %v551_v30 }
 0x4d6   :  { %v506_v31 = vpop.xlane.xlu1 %505  ;;  %v531_v32 = vpop.xlane.xlu0 %530 }
 0x4d7   :  { %754 = vrcp.f32 %v506_v31 }
 0x4d8   :  { %756 = vrcp.f32 %v531_v32 }
 0x4da   :  { %v533_v33 = vpop.xlane.xlu1 %532 }
 0x4db   :  { %758 = vrcp.f32 %v533_v33 }
 0x4dd   :  { %v749_v34 = vpop.eup %748 }
 0x4de   :  { %v751_v35 = vpop.eup %750  ;;  %v509_v37 = vmul.f32 %v749_v34, %v741_v24 }
 0x4df   :  { %v753_v36 = vpop.eup %752  ;;  %v554_v39 = vadd.f32 1.0, %v751_v35 }
 0x4e0   :  { %v511_v44 = vsel %vm487_vm6, %v509_v37, 0.0  ;;  %v555_v47 = vadd.f32 1.0, %v753_v36 }
 0x4e1   :  { %v755_v38 = vpop.eup %754  ;;  %v556_v50 = vmul.f32 0.5, %v554_v39 }
 0x4e2   :  { %v757_v40 = vpop.eup %756  ;;  %v510_v41 = vmul.f32 %v755_v38, %v745_v26  ;;  %v557_v57 = vmul.f32 0.5, %v555_v47 }
 0x4e3   :  { %v536_v42 = vmul.f32 %v757_v40, %v743_v25 }
 0x4e4   :  { %v512_v53 = vsel %vm487_vm6, %v510_v41, 0.0 }
 0x4e5   :  { %v759_v48 = vpop.eup %758  ;;  %v538_v49 = vsel %vm1021_vm5, %v536_v42, %v511_v44 }
 0x4e6   :  { %v537_v51 = vmul.f32 %v759_v48, %v747_v27  ;;  %v545_v52 = vsel %vm1060_vm11, %v543_v45, %v538_v49 }
 0x4e7   :  { %v558_v55 = vsel %vm1067_vm12, %v556_v50, %v545_v52 }
 0x4e8   :  { %v539_v56 = vsel %vm1021_vm5, %v537_v51, %v512_v53  ;;  %560 = vst [vmem:[#allocation8] sm:$0xff] %v558_v55 }
 0x4e9   :  { %v546_v58 = vsel %vm1060_vm11, %v544_v54, %v539_v56 }
 0x4ea   :  { %v559_v60 = vsel %vm1067_vm12, %v557_v57, %v546_v58 }
 0x4eb   :  { %561 = vst [vmem:[#allocation8 + $0x8] sm:$0xff] %v559_v60 }
 0x4ec   :  { %837 = shalt.err (!%p834_p0)
}
 0x4ed   :  { %s838_s10 = scalar_lea.hbm %s1107_s9, 256 }
 0x4ee   :  { %p839_p1 = scmp.ne.s32.totalorder %s1107_s9, %s838_s10  ;;  %p842_p2 = scmp.lt.u32.totalorder %s838_s10, %s1107_s9 }
 0x4f0   :  { %p844_p3 = pnand %p842_p2, %p839_p1 }
 0x4f2   :  { %847 = shalt.err (!%p844_p3)
}
 0x4f3   :  { %s862_s18 = smov 128   ;;  %s863_s19 = smov 8  }
 0x4f4   :  { %573 = dma.vmem_to_hbm [thread:$0]  %s568_s8, 256, %s1107_s9, [#allocation4], %s862_s18, %s862_s18, %s863_s19  }
 0x4f5   :  { %852 = dma.done.wait [#allocation4], 256  }
 0x4f6   :  { %853 = vsyncadd [#allocation4], 4294967040 }
 0x4f7   :  { %577 = vsyncpa [#allocation3], 1 }
 0x4f8   :  { %578 = vsyncpa [#allocation6], 1 }
 0x4f9   :  { %579 = vsyncpa [#allocation4], 1 }

</bundles_post_ra>
